<compile_context>
chip_gen: v7x
topology: tpu7x:2x2x1
jax: 0.10.0
libtpu: 0.0.40
codegen_flags: <defaults>
</compile_context>

<pallas_src>
import numpy as np
import jax
import jax.numpy as jnp
from jax.experimental import pallas as pl
from jax.experimental.pallas import tpu as pltpu


def _round_up(x, m):
    return (x + m - 1) // m * m


def _make_render_kernel(tk, tn, cp, n_tiles):
    """Per-tile kernel with static tile geometry baked in."""

    def kernel(hc_ref, km_ref, src_ref, f3_ref, o_ref, acc_ref):
        # hc_ref : (bs, n_tiles)        int32 SMEM  -- # of hit k-blocks per (b, n)
        # km_ref : (bs*n_tiles, KB)     int32 SMEM  -- hit k-block ids, hits first
        # src_ref: (1, 1, TN)           int32 VMEM  -- flat feature column, -1 = masked
        # f3_ref : (1, 3*Cp, TK)        bf16  VMEM  -- stacked hi/mid/lo feature planes
        # o_ref  : (1, Cp, TN)          f32
        # acc_ref: (Cp, TN)             f32 scratch -- lives across the j axis
        b = pl.program_id(0)
        n = pl.program_id(1)
        j = pl.program_id(2)

        @pl.when(j == 0)
        def _init():
            acc_ref[...] = jnp.zeros_like(acc_ref)

        # Only do work for k-blocks that actually contain referenced columns.
        @pl.when(j < hc_ref[b, n])
        def _compute():
            kb = km_ref[b * n_tiles + n, j]
            local = src_ref[0] - kb * tk                                # (1, TN)
            iota = jax.lax.broadcasted_iota(jnp.int32, (tk, tn), 0)     # (TK, TN)
            onehot = (iota == local).astype(jnp.bfloat16)               # exact 0/1
            # Single MXU pass: (3*Cp, TK) @ (TK, TN) with f32 accumulation.
            r = jnp.dot(f3_ref[0], onehot,
                        preferred_element_type=jnp.float32)             # (3*Cp, TN)
            # hi + mid + lo == f exactly; slabs are 8-sublane aligned.
            acc_ref[...] += r[0:cp] + r[cp:2 * cp] + r[2 * cp:3 * cp]

        @pl.when(j == pl.num_programs(2) - 1)
        def _flush():
            o_ref[0] = acc_ref[...].astype(o_ref.dtype)

    return kernel


def feature_render(feature, dense_pose, *, tk=512, tn=512):
    """Pallas equivalent of FeatureRender.forward(feature, dense_pose).

    feature   : (bs, c, h, w)  float
    dense_pose: (bs, dh, dw, 3) with [I, U, V] per pixel
    returns   : (bs, c, dh, dw) float32
    """
    bs, c, h, w = feature.shape
    _, dh, dw, _ = dense_pose.shape
    hf = h // 4
    wf = w // 6
    HW = h * w
    S = dh * dw
    cp = _round_up(c, 8)   # pad channels to full sublanes (unmasked stores)

    # ---- tile sizes: multiples of 256 (256x256 MXU on v6e/v7x), capped at 1024
    # so (tk, tn) transients stay well under v7x's 64 MiB VMEM.
    tk = _round_up(max(256, min(int(tk), _round_up(HW, 256), 1024)), 256)
    tn = _round_up(max(256, min(int(tn), _round_up(S, 256), 1024)), 256)
    # v7x has 2 TensorCores: keep >=4 blocks on the parallel axes when possible.
    if tn > 256 and bs * (_round_up(S, tn) // tn) < 4:
        tn = 256
    hw_pad = _round_up(HW, tk)
    s_pad = _round_up(S, tn)
    KB = hw_pad // tk
    n_tiles = s_pad // tn

    # ---- index/mask precompute (cheap fused XLA elementwise) -------------------
    I = dense_pose[..., 0].astype(jnp.int32)
    U = dense_pose[..., 1].astype(jnp.float32)
    V = dense_pose[..., 2].astype(jnp.float32)
    # Aliased-scatter semantics of the original module: mask = (I>=1) & (V!=0).
    mask = jnp.logical_and(I >= 1, V != 0.0)
    # Same arithmetic order as PyTorch: x * (frac - 1) / 255.0, then trunc.
    u_idx = (U * float(hf - 1) / 255.0).astype(jnp.int32)
    v_idx = ((255.0 - V) * float(wf - 1) / 255.0).astype(jnp.int32)
    p = jnp.maximum(I - 1, 0)
    row = (p // 6) * hf + u_idx
    col = (p % 6) * wf + v_idx
    src_flat = jnp.where(mask, row * w + col, -1).reshape(bs, S)
    src_flat = jnp.pad(src_flat, ((0, 0), (0, s_pad - S)), constant_values=-1)

    # ---- per-(batch, S-tile) hit-block map for the reduction axis --------------
    src_t = src_flat.reshape(bs, n_tiles, tn)
    kb_ids = jnp.where(src_t >= 0, src_t // tk, KB)          # KB = "no hit" bucket
    b_ix = jnp.arange(bs)[:, None, None]
    n_ix = jnp.arange(n_tiles)[None, :, None]
    hits = jnp.zeros((bs, n_tiles, KB + 1), jnp.int32)
    hits = hits.at[b_ix, n_ix, kb_ids].set(1)[..., :KB]      # (bs, n_tiles, KB)
    hit_count = hits.sum(axis=-1).astype(jnp.int32)          # (bs, n_tiles)
    kb_ar = jnp.arange(KB, dtype=jnp.int32)
    kmap = jnp.argsort(jnp.where(hits > 0, kb_ar, kb_ar + KB),
                       axis=-1).astype(jnp.int32)            # hit blocks first
    # Tail repeats the last hit block so the pipeline elides DMA on dead steps.
    last = jnp.take_along_axis(kmap, jnp.maximum(hit_count - 1, 0)[..., None], axis=-1)
    kmap = jnp.where(kb_ar[None, None, :] < hit_count[..., None], kmap, last)
    kmap = kmap.reshape(bs * n_tiles, KB)

    # ---- exact 3-way bf16 split of the f32 feature map (done once, here) -------
    f = feature.reshape(bs, c, HW).astype(jnp.float32)
    f_hi = f.astype(jnp.bfloat16)
    r1 = f - f_hi.astype(jnp.float32)
    f_mid = r1.astype(jnp.bfloat16)
    r2 = r1 - f_mid.astype(jnp.float32)
    f_lo = r2.astype(jnp.bfloat16)

    def _plane(x):
        return jnp.pad(x, ((0, 0), (0, cp - c), (0, hw_pad - HW)))

    f3 = jnp.concatenate([_plane(f_hi), _plane(f_mid), _plane(f_lo)], axis=1)

    src = src_flat[:, None, :]                                # (bs, 1, s_pad)
    grid = (bs, n_tiles, KB)
    out = pl.pallas_call(
        _make_render_kernel(tk, tn, cp, n_tiles),
        out_shape=jax.ShapeDtypeStruct((bs, cp, s_pad), jnp.float32),
        grid_spec=pltpu.PrefetchScalarGridSpec(
            num_scalar_prefetch=2,
            grid=grid,
            in_specs=[
                pl.BlockSpec((1, 1, tn), lambda b, n, j, hc, km: (b, 0, n)),
                pl.BlockSpec((1, 3 * cp, tk),
                             lambda b, n, j, hc, km: (b, 0, km[b * n_tiles + n, j])),
            ],
            out_specs=pl.BlockSpec((1, cp, tn), lambda b, n, j, hc, km: (b, 0, n)),
            scratch_shapes=[pltpu.VMEM((cp, tn), jnp.float32)],
        ),
        compiler_params=pltpu.CompilerParams(
            dimension_semantics=("parallel", "parallel", "arbitrary"),
        ),
    )(hit_count, kmap, src, f3)
    return out[:, :c, :S].reshape(bs, c, dh, dw)


def _reference_numpy(feature, dense_pose):
    """Plain-numpy re-implementation of the PyTorch forward (for validation)."""
    feature = np.asarray(feature, dtype=np.float32)
    dp = np.asarray(dense_pose, dtype=np.float32)
    bs, c, h, w = feature.shape
    _, dh, dw, _ = dp.shape
    hf = h // 4
    wf = w // 6

    I = dp[..., 0].astype(np.int32)
    U = dp[..., 1].astype(np.float32)
    V = dp[..., 2].astype(np.float32)
    mask = (I >= 1) & (V != 0.0)

    u_idx = (U * np.float32(hf - 1) / np.float32(255.0)).astype(np.int32)
    v_idx = ((np.float32(255.0) - V) * np.float32(wf - 1) /
             np.float32(255.0)).astype(np.int32)
    p = np.maximum(I - 1, 0)
    row = (p // 6) * hf + u_idx
    col = (p % 6) * wf + v_idx

    b_idx = np.arange(bs)[:, None, None]
    gathered = feature[b_idx, :, row, col]            # (bs, dh, dw, c)
    out = np.where(mask[..., None], gathered, np.float32(0.0))
    return out.transpose(0, 3, 1, 2)                  # (bs, c, dh, dw)


def _make_inputs(key, bs, c, h, w, dh, dw):
    k1, k2, k3, k4 = jax.random.split(key, 4)
    feature = jax.random.normal(k1, (bs, c, h, w), dtype=jnp.float32)
    I = jax.random.randint(k2, (bs, dh, dw), 0, 25).astype(jnp.float32)
    U = jax.random.randint(k3, (bs, dh, dw), 0, 256).astype(jnp.float32)
    V = jax.random.randint(k4, (bs, dh, dw), 0, 256).astype(jnp.float32)
    dense_pose = jnp.stack([I, U, V], axis=-1)        # (bs, dh, dw, 3)
    return feature, dense_pose


if __name__ == "__main__":
    key = jax.random.PRNGKey(0)
    key_a, key_b = jax.random.split(key)

    # Config A: small, single k-block, single S-tile (hf = 4, wf = 4).
    feature_a, dp_a = _make_inputs(key_a, bs=2, c=4, h=16, w=24, dh=16, dw=16)
    out_a = jax.block_until_ready(feature_render(feature_a, dp_a))
    np.testing.assert_allclose(np.asarray(out_a), _reference_numpy(feature_a, dp_a),
                               rtol=1e-6, atol=1e-6)

    # Config B: exercises the hit-block map, multi-tile contraction and padding
    # on both axes (HW=1536 -> 6 k-blocks of 256, S=576 -> 3 n-tiles of 256).
    feature_b, dp_b = _make_inputs(key_b, bs=2, c=4, h=32, w=48, dh=24, dw=24)
    out_b = jax.block_until_ready(feature_render(feature_b, dp_b, tk=256, tn=256))
    np.testing.assert_allclose(np.asarray(out_b), _reference_numpy(feature_b, dp_b),
                               rtol=1e-6, atol=1e-6)

    print("KERNEL_OK")
</pallas_src>

<mosaic_0001>
module attributes {stable_mosaic.version = 11 : i64} {
  func.func @kernel(%arg0: i32, %arg1: i32, %arg2: i32, %arg3: memref<2x1xi32, #tpu.memory_space<smem>>, %arg4: memref<2x1xi32, #tpu.memory_space<smem>>, %arg5: memref<1x1x256xi32, #tpu.memory_space<vmem>>, %arg6: memref<1x24x512xbf16, #tpu.memory_space<vmem>>, %arg7: memref<1x8x256xf32, #tpu.memory_space<vmem>>, %arg8: memref<8x256xf32, #tpu.memory_space<vmem>>) attributes {dimension_semantics = [#tpu.dimension_semantics<parallel>, #tpu.dimension_semantics<parallel>, #tpu.dimension_semantics<arbitrary>], iteration_bounds = array<i64: 2, 1, 1>, scalar_prefetch = 2 : i64, scratch_operands = 1 : i64, tpu.core_type = #tpu.core_type<tc>, window_params = [{transform_indices = @transform_0, window_bounds = array<i64: 1, 1, 256>}, {transform_indices = @transform_1, window_bounds = array<i64: 1, 24, 512>}, {transform_indices = @transform_2, window_bounds = array<i64: 1, 8, 256>}]} {
    %c0_i32 = arith.constant 0 : i32
    %0 = arith.cmpi eq, %arg2, %c0_i32 : i32
    %1 = arith.extui %0 : i1 to i32
    %c0_i32_0 = arith.constant 0 : i32
    %2 = arith.cmpi ne, %1, %c0_i32_0 : i32
    scf.if %2 {
      %cst = arith.constant 0.000000e+00 : f32
      %12 = vector.broadcast %cst : f32 to vector<8x256xf32>
      %c0 = arith.constant 0 : index
      %c0_4 = arith.constant 0 : index
      %13 = vector.load %arg8[%c0, %c0_4] : memref<8x256xf32, #tpu.memory_space<vmem>>, vector<8x256xf32>
      tpu.vector_store %arg8[%c0, %c0_4], %12 {strides = array<i32>} : memref<8x256xf32, #tpu.memory_space<vmem>>, vector<8x256xf32>,
    } else {
    }
    %3 = arith.index_cast %arg0 : i32 to index
    %4 = arith.index_cast %arg1 : i32 to index
    %5 = memref.load %arg3[%3, %4] : memref<2x1xi32, #tpu.memory_space<smem>>
    %6 = arith.cmpi slt, %arg2, %5 : i32
    %7 = arith.extui %6 : i1 to i32
    %c0_i32_1 = arith.constant 0 : i32
    %8 = arith.cmpi ne, %7, %c0_i32_1 : i32
    scf.if %8 {
      %c1_i32 = arith.constant 1 : i32
      %12 = arith.muli %arg0, %c1_i32 : i32
      %13 = arith.addi %12, %arg1 : i32
      %14 = arith.index_cast %13 : i32 to index
      %15 = arith.index_cast %arg2 : i32 to index
      %16 = memref.load %arg4[%14, %15] : memref<2x1xi32, #tpu.memory_space<smem>>
      %c0 = arith.constant 0 : index
      %c0_4 = arith.constant 0 : index
      %c0_5 = arith.constant 0 : index
      %17 = vector.load %arg5[%c0, %c0_4, %c0_5] : memref<1x1x256xi32, #tpu.memory_space<vmem>>, vector<1x1x256xi32>
      %18 = vector.shape_cast %17 : vector<1x1x256xi32> to vector<1x256xi32>
      %c512_i32 = arith.constant 512 : i32
      %19 = arith.muli %16, %c512_i32 : i32
      %20 = vector.broadcast %19 : i32 to vector<1x256xi32>
      %21 = arith.subi %18, %20 : vector<1x256xi32>
      %22 = tpu.iota {dimensions = array<i32: 0>} : vector<512x256xi32>
      %23 = vector.broadcast %21 : vector<1x256xi32> to vector<512x256xi32>
      %24 = arith.cmpi eq, %22, %23 : vector<512x256xi32>
      %25 = arith.extui %24 : vector<512x256xi1> to vector<512x256xi32>
      %26 = arith.sitofp %25 : vector<512x256xi32> to vector<512x256xf32>
      %27 = arith.truncf %26 : vector<512x256xf32> to vector<512x256xbf16>
      %c0_6 = arith.constant 0 : index
      %c0_7 = arith.constant 0 : index
      %c0_8 = arith.constant 0 : index
      %28 = vector.load %arg6[%c0_6, %c0_7, %c0_8] : memref<1x24x512xbf16, #tpu.memory_space<vmem>>, vector<1x24x512xbf16>
      %29 = vector.shape_cast %28 : vector<1x24x512xbf16> to vector<24x512xbf16>
      %cst = arith.constant dense<0.000000e+00> : vector<24x256xf32>
      %30 = tpu.matmul %29, %27, %cst {dimension_numbers = #tpu.dot_dimension_numbers<[1], [0], [0], [1], [0, 0, 1, 1], [], []>} : vector<24x512xbf16>, vector<512x256xbf16>, vector<24x256xf32> -> vector<24x256xf32>
      %c0_9 = arith.constant 0 : index
      %c0_10 = arith.constant 0 : index
      %31 = vector.load %arg8[%c0_9, %c0_10] : memref<8x256xf32, #tpu.memory_space<vmem>>, vector<8x256xf32>
      %32 = vector.extract_strided_slice %30 {offsets = [0, 0], sizes = [8, 256], strides = [1, 1]} : vector<24x256xf32> to vector<8x256xf32>
      %33 = vector.extract_strided_slice %30 {offsets = [8, 0], sizes = [8, 256], strides = [1, 1]} : vector<24x256xf32> to vector<8x256xf32>
      %34 = arith.addf %32, %33 : vector<8x256xf32>
      %35 = vector.extract_strided_slice %30 {offsets = [16, 0], sizes = [8, 256], strides = [1, 1]} : vector<24x256xf32> to vector<8x256xf32>
      %36 = arith.addf %34, %35 : vector<8x256xf32>
      %37 = arith.addf %31, %36 : vector<8x256xf32>
      %c0_11 = arith.constant 0 : index
      %c0_12 = arith.constant 0 : index
      %38 = vector.load %arg8[%c0_11, %c0_12] : memref<8x256xf32, #tpu.memory_space<vmem>>, vector<8x256xf32>
      tpu.vector_store %arg8[%c0_11, %c0_12], %37 {strides = array<i32>} : memref<8x256xf32, #tpu.memory_space<vmem>>, vector<8x256xf32>,
    } else {
    }
    %c0_i32_2 = arith.constant 0 : i32
    %9 = arith.cmpi eq, %arg2, %c0_i32_2 : i32
    %10 = arith.extui %9 : i1 to i32
    %c0_i32_3 = arith.constant 0 : i32
    %11 = arith.cmpi ne, %10, %c0_i32_3 : i32
    scf.if %11 {
      %c0 = arith.constant 0 : index
      %c0_4 = arith.constant 0 : index
      %12 = vector.load %arg8[%c0, %c0_4] : memref<8x256xf32, #tpu.memory_space<vmem>>, vector<8x256xf32>
      %c0_5 = arith.constant 0 : index
      %c0_6 = arith.constant 0 : index
      %c0_7 = arith.constant 0 : index
      %13 = vector.load %arg7[%c0_5, %c0_6, %c0_7] : memref<1x8x256xf32, #tpu.memory_space<vmem>>, vector<1x8x256xf32>
      %14 = vector.shape_cast %13 : vector<1x8x256xf32> to vector<8x256xf32>
      %15 = vector.shape_cast %12 : vector<8x256xf32> to vector<1x8x256xf32>
      tpu.vector_store %arg7[%c0_5, %c0_6, %c0_7], %15 {strides = array<i32>} : memref<1x8x256xf32, #tpu.memory_space<vmem>>, vector<1x8x256xf32>,
    } else {
    }
    return
  }
  func.func @transform_0(%arg0: i32, %arg1: i32, %arg2: i32, %arg3: memref<2x1xi32, #tpu.memory_space<smem>>, %arg4: memref<2x1xi32, #tpu.memory_space<smem>>) -> (i32, i32, i32) {
    %c0_i32 = arith.constant 0 : i32
    %c0_i32_0 = arith.constant 0 : i32
    return %arg0, %c0_i32, %arg1 : i32, i32, i32
  }
  func.func @transform_1(%arg0: i32, %arg1: i32, %arg2: i32, %arg3: memref<2x1xi32, #tpu.memory_space<smem>>, %arg4: memref<2x1xi32, #tpu.memory_space<smem>>) -> (i32, i32, i32) {
    %c1_i32 = arith.constant 1 : i32
    %0 = arith.muli %arg0, %c1_i32 : i32
    %1 = arith.addi %0, %arg1 : i32
    %2 = arith.index_cast %1 : i32 to index
    %3 = arith.index_cast %arg2 : i32 to index
    %4 = memref.load %arg4[%2, %3] : memref<2x1xi32, #tpu.memory_space<smem>>
    %c0_i32 = arith.constant 0 : i32
    %c0_i32_0 = arith.constant 0 : i32
    return %arg0, %c0_i32, %4 : i32, i32, i32
  }
  func.func @transform_2(%arg0: i32, %arg1: i32, %arg2: i32, %arg3: memref<2x1xi32, #tpu.memory_space<smem>>, %arg4: memref<2x1xi32, #tpu.memory_space<smem>>) -> (i32, i32, i32) {
    %c0_i32 = arith.constant 0 : i32
    %c0_i32_0 = arith.constant 0 : i32
    return %arg0, %c0_i32, %arg1 : i32, i32, i32
  }
}

</mosaic_0001>

<bundles_post_ra>
// kernel: tpu_custom_call.1
= control target key start
LH: loop header
LB: loop body
LE: loop exit
PB: predicated region body
PF: predicated region fallthrough
CT: control target
= control target key end

     0   :  { %s2255_s0 = inlined_call_operand.vmem [shape: s32[2,1], index: 0, kind: input, shape index: {}]   ;;  %s2256_s2 = inlined_call_operand.vmem [shape: s32[2,1,256], index: 2, kind: input, shape index: {}]   ;;  %s2257_s3 = inlined_call_operand.hbm [shape: bf16[2,24,512], index: 3, kind: input, shape index: {}]   ;;  %s2258_s4 = inlined_call_operand.hbm [shape: f32[2,8,256], index: 4, kind: output, shape index: {}]   ;;  %s2259_s1 = inlined_call_operand.vmem [shape: s32[2,1], index: 1, kind: input, shape index: {}]  }
   0x1   :  { %s9_s17 = sshll.u32 %s2255_s0, 4  ;;  %s13_s20 = sshll.u32 %s2259_s1, 4  ;;  %s10_s17 = int_to_ptr.vmem [resolvable:$true] %s9_s17  ;;  %s14_s20 = int_to_ptr.vmem [resolvable:$true] %s13_s20 }
   0x2   :  { %s1500_s21 = scalar_lea.vmem %s10_s17, 32  ;;  %p1505_p1 = scmp.lt.s32.totalorder %s10_s17, %s10_s17 }
   0x3   :  { %p1501_p0 = scmp.ne.s32.totalorder %s10_s17, %s1500_s21  ;;  %p1506_p2 = scmp.lt.s32.totalorder %s1500_s21, %s1500_s21 }
   0x5   :  { %p1507_p3 = por %p1506_p2, %p1505_p1 }
   0x7   :  { %p1508_p4 = pnand %p1507_p3, %p1501_p0 }
   0x9   :  { %1511 = shalt.err (!%p1508_p4)  }
   0xa   :  { %s1664_s22 = smov [#allocation4]   ;;  %s1512_s23 = scalar_lea.vmem %s14_s20, 32 }
   0xb   :  { %12 = dma.vmem_to_smem %s10_s17, 32, %s1664_s22, [#allocation3] }
   0xc   :  { %p1513_p5 = scmp.ne.s32.totalorder %s14_s20, %s1512_s23  ;;  %p1517_p6 = scmp.lt.s32.totalorder %s14_s20, %s14_s20 }
   0xd   :  { %p1518_p7 = scmp.lt.s32.totalorder %s1512_s23, %s1512_s23 }
   0xf   :  { %p1519_p8 = por %p1518_p7, %p1517_p6 }
  0x11   :  { %p1520_p9 = pnand %p1519_p8, %p1513_p5 }
  0x13   :  { %1523 = shalt.err (!%p1520_p9)  }
  0x14   :  { %s1665_s0 = smov [#allocation5]  }
  0x15   :  { %16 = dma.vmem_to_smem %s14_s20, 32, %s1665_s0, [#allocation3] }
  0x16   :  { %1618 = dma.done.wait [#allocation3], 64 }
  0x17   :  { %1619 = vsyncadd [#allocation3], 4294967232 }
  0x18   :  { %18 = sfence }
  0x19   :  { %19 = vsyncpa [#allocation7], 0 }
  0x1a   :  { %21 = vsyncpa [#allocation7 + $0x1], 0 }
  0x1b   :  { %22 = vsyncpa [#allocation8], 0 }
  0x1c   :  { %24 = vsyncpa [#allocation8 + $0x1], 0  ;;  %s1703_s1 = smov 0   ;;  %s1705_s24 = smov 0  }
  0x1d   :  { %s1707_s25 = smov 0   ;;  %s1709_s26 = smov 0  }
  0x1e   :  { %s1711_s27 = smov 0   ;;  %s1713_s28 = smov 0  }
  0x1f   :  { %s1715_s29 = smov 0   ;;  %s1717_s30 = smov 0  }
  0x20   :  { %s1719_s5 = smov 0  }
  0x21 LB: > { %s1100_s6 = sadd.s32 4294967295, %s1662_s5   ;;  %s1101_s7 = sadd.s32 4294967294, %s1662_s5   ;;  %s1662_s5 = sphi %s1719_s5, %s30_s5   ;;  %s1658_s30 = sphi %s1717_s30, %s2284_s30   ;;  %s1654_s29 = sphi %s1715_s29, %s2283_s29   ;;  %s1650_s28 = sphi %s1713_s28, %s2282_s28   ;;  %s1646_s27 = sphi %s1711_s27, %s2281_s27   ;;  %s1642_s26 = sphi %s1709_s26, %s2280_s26   ;;  %s1638_s25 = sphi %s1707_s25, %s2279_s25   ;;  %s1634_s24 = sphi %s1705_s24, %s2278_s24   ;;  %s1630_s1 = sphi %s1703_s1, %s2277_s1  }
  0x22   : > { %s49_s8 = sadd.s32 1, %s1658_s30  ;;  %s1102_s9 = sshll.u32 %s1658_s30, 7 }
  0x23   : > { %p51_p10 = scmp.ge.s32.totalorder %s49_s8, 2  ;;  %s89_s10 = sld [smem:[#allocation5 + %s1102_s9]] }
  0x24   : > { %s104_s11 = sadd.s32 1, %s1650_s28  ;;  %p111_p11 = scmp.ne.s32.totalorder %s1650_s28, %s1646_s27 }
  0x25   : > { %s2286_s8 = smov (%p51_p10, %s49_s8), 0  ;;  %p112_p12 = scmp.eq.s32.totalorder %s1662_s5, 0 }
  0x26   : > { %2263 = sst [smem:[#allocation15_spill]] %s2286_s8  ;;  %p117_p13 = scmp.ne.s32.totalorder %s1646_s27, %s1642_s26 }
  0x27   : > { %s1103_s12 = sshll.u32 %s2286_s8, 7  ;;  %s99_s13 = ssub.s32 %s1658_s30, %s2286_s8 }
  0x28   : > { %s98_s14 = sld [smem:[#allocation5 + %s1103_s12]]  ;;  %p1762_p0 = por %p112_p12, %p111_p11 }
  0x29   : > { %p118_p1 = scmp.eq.s32.totalorder %s1100_s6, 0  ;;  %p130_p2 = scmp.eq.s32.totalorder %s99_s13, 0 }
  0x2a   : > { %s132_s16 = sadd.s32 1, %s1638_s25  ;;  %p142_p3 = scmp.ne.s32.totalorder %s1638_s25, %s1634_s24 }
  0x2b   : > { %p1769_p4 = por %p118_p1, %p117_p13  ;;  %p143_p5 = scmp.eq.s32.totalorder %s1100_s6, 1 }
  0x2c   : > { %s1774_s18 = scalar_select %p130_p2, %s1638_s25, %s132_s16  }
  0x2d   : > { %s2265_s17 = scalar_select %p1769_p4, 1, 0 }
  0x2e   : > { %p1776_p6 = por %p143_p5, %p142_p3  ;;  %p148_p7 = scmp.ne.s32.totalorder %s1634_s24, %s1630_s1 }
  0x2f   : > { %s100_s20 = ssub.s32 %s89_s10, %s98_s14  ;;  %p149_p8 = scmp.eq.s32.totalorder %s1101_s7, 1 }
  0x30   : > { %s2266_s19 = scalar_select %p1776_p6, 1, 0 }
  0x31   : > { %s101_s21 = sor.u32 %s100_s20, %s99_s13  ;;  %p1783_p11 = por %p149_p8, %p148_p7 }
  0x32   : > { %p102_p10 = scmp.eq.s32.totalorder %s101_s21, 0  ;;  %s181_s23 = sand.u32 1, %s1650_s28  }
  0x33   : > { %s2267_s22 = scalar_select %p1783_p11, 1, 0 }
  0x34   : > { %s1789_s0 = scalar_select %p102_p10, %s1650_s28, %s104_s11  }
  0x35   : > { %p1410_p12 = scmp.lt.s32.totalorder %s1662_s5, 2  ;;  %s1391_s6 = smul.u32 48, %s181_s23 }
  0x36   : > { %2268 = sst [smem:[#allocation16_spill]] %s1789_s0  ;;  %s2288_s9 = smov (!%p1762_p0, %s1102_s9), 0 }
  0x37   : > { %s1394_s26 = scalar_select %p1762_p0, [#allocation5], [#allocation10] }
  0x38   : > { %s2292_s9 = smov (!%p1410_p12, %s2288_s9), 0  ;;  %p1800_p13 = pnand %p1410_p12, %p1762_p0 }
  0x39   : > { %s2290_s26 = smov (!%p1410_p12, %s1394_s26), [#allocation11]  ;;  %s185_s12 = scalar_lea.vmem [#allocation6], %s1391_s6 }
  0x3a   : > { %s194_s10 = sld [smem:[%s2290_s26 + %s2292_s9]]  ;;  %s203_s11 = sshll.u32 %s185_s12, 4  ;;  %s1807_s11 = int_to_ptr.vmem [resolvable:$true] %s203_s11 }
  0x3b   : > { %p1109_p1 = scmp.ge.s32.totalorder %s1662_s5, 1  ;;  %s1392_s13 = smul.u32 12, %s1658_s30 }
  0x3c   : > { %p211_p2 = scmp.lt.s32.totalorder %s1662_s5, 3  ;;  %s1818_s9 = scalar_lea.sflag [#allocation7], %s181_s23 }
  0x3d   : > { %p1526_p5 = pneg %p1800_p13  ;;  %s1529_s8 = scalar_lea.hbm %s2257_s3, 1536 }
  0x3e   : > { %p1809_p3 = pnand %p1109_p1, %p211_p2 }
  0x40   : > { %s1107_s16 = sshll.u32 %s194_s10, 2 }
  0x41   : > { %s200_s15 = sadd.s32 %s1392_s13, %s1107_s16 }
  0x42   : > { %s1108_s20 = sshll.u32 %s200_s15, 6 }
  0x43   : > { %s1816_s0 = scalar_lea.hbm %s2257_s3, %s1108_s20 }
  0x44   : > { %s1524_s26 = scalar_lea.hbm %s1816_s0, 768  ;;  %p1530_p10 = scmp.lt.u32.totalorder %s1816_s0, %s2257_s3 }
  0x45   : > { %p1525_p0 = scmp.ne.s32.totalorder %s1816_s0, %s1524_s26  ;;  %p1531_p12 = scmp.lt.u32.totalorder %s1529_s8, %s1524_s26 }
  0x46   : > { %p1533_p2 = scmp.lt.u32.totalorder %s1524_s26, %s1816_s0 }
  0x47   : > { %p1527_p7 = pnand %p1526_p5, %p1525_p0  ;;  %p1532_p1 = por %p1531_p12, %p1530_p10 }
  0x49   : > { %p1528_p8 = pneg %p1527_p7  ;;  %p1534_p9 = por %p1533_p2, %p1532_p1 }
  0x4b   : > { %p1535_p11 = pnand %p1534_p9, %p1528_p8 }
  0x4d   : > { %1538 = shalt.err (!%p1535_p11)
}
  0x4e   : > { %s1539_s23 = scalar_lea.vmem %s1807_s11, 768  ;;  %s1666_s16 = smov [#allocation6]  }
  0x4f   : > { %p1540_p0 = scmp.ne.s32.totalorder %s1807_s11, %s1539_s23  ;;  %s1544_s15 = sshll.u32 %s1666_s16, 4  ;;  %s1545_s15 = int_to_ptr.vmem [resolvable:$false] %s1544_s15 }
  0x50   : > { %s1546_s20 = scalar_lea.vmem %s1545_s15, 1536  ;;  %p1547_p4 = scmp.lt.s32.totalorder %s1807_s11, %s1545_s15 }
  0x51   : > { %p1542_p7 = pnand %p1540_p0, %p1526_p5  ;;  %p1548_p10 = scmp.lt.s32.totalorder %s1546_s20, %s1539_s23 }
  0x53   : > { %p1543_p6 = pneg %p1542_p7  ;;  %p1549_p12 = por %p1548_p10, %p1547_p4 }
  0x55   : > { %p1550_p1 = pnand %p1549_p12, %p1543_p6 }
  0x57   : > { %1553 = shalt.err (!%p1550_p1)
}
  0x58   : > { %s1667_s21 = smov 256   ;;  %s1668_s26 = smov 16  }
  0x59   : > { %1405 = dma.hbm_to_vmem [thread:$0]  (!%p1800_p13), %s1816_s0, 768, %s1807_s11, %s1818_s9, %s1667_s21, %s1667_s21, %s1668_s26  }
  0x5a   : > { %215 = sbr.rel (%p1809_p3) target bundleno = 439 (0x1b7), region = 28  ;;  %s217_s6 = sand.u32 (!%p1809_p3), 1, %s1646_s27  }
  0x5b   : > { %s1393_s10 = smul.u32 (!%p1809_p3), 48, %s217_s6  ;;  %s218_s8 = scalar_lea.sflag (!%p1809_p3), [#allocation7], %s217_s6 }
  0x5c   : > { %p2271_p4 = scmp.ne.s32.totalorder (!%p1809_p3), %s2265_s17, 0 }
  0x5d   : > { %s1849_s12 = scalar_lea.vmem (!%p1809_p3), [#allocation6], %s1393_s10 }
  0x61   : > { %1621 = dma.done.wait (%p2271_p4), %s218_s8, 768  }
  0x62   : > { %1623 = vsyncadd (%p2271_p4), %s218_s8, 4294966528  ;;  %s1112_s0 = sshll.u32 %s1654_s29, 7  ;;  %s247_s7 = sand.u32 1, %s1634_s24   ;;  %v1669_v0 = vmov 0.0  }
  0x63   : > { %s283_s11 = sld [smem:[#allocation4 + %s1112_s0]]  ;;  %s1110_s14 = sshll.u32 %s247_s7, 4  ;;  %274 = vst [vmem:[#allocation2] sm:$0xff] %v1669_v0  ;;  %275 = vst [vmem:[#allocation2 + $0x8] sm:$0xff] %v1669_v0 }
  0x64   : > { %p251_p6 = scmp.lt.s32.totalorder %s1654_s29, 1  ;;  %s1864_s15 = scalar_lea.vmem [#allocation9], %s1110_s14 }
  0x66   : > { %s252_s9 = scalar_select %p251_p6, %s1654_s29, 1 }
  0x68   : > { %s1111_s13 = sshll.u32 %s252_s9, 1 }
  0x69   : > { %s257_s17 = scalar_lea.vmem %s2256_s2, %s1111_s13  ;;  %p1114_p9 = scmp.le.s32.totalorder %s283_s11, 0 }
  0x6a   : > { %s296_s20 = sld [smem:[#allocation5 + %s1112_s0]] (!%p1114_p9)  ;;  %v301_v1 = vlaneseq (!%p1114_p9)  ;;  %v1492_v2 = vld [vmem:[%s1849_s12 + $0x4] ss:$16 sps:$4 sm:$0xff] (!%p1114_p9)   ;;  %v1495_v4 = vld [vmem:[%s1849_s12 + $0xc] ss:$16 sps:$4 sm:$0xff] (!%p1114_p9)  }
  0x6b   : > { %287 = sbr.rel (%p1114_p9) target bundleno = 414 (0x19e), region = 40  ;;  %894 = vmatprep.mubr.bf16.mxu1 (!%p1114_p9), %v1492_v2  ;;  %v297_v5 = vld [vmem:[%s257_s17] sm:$0x3] (!%p1114_p9)  ;;  %945 = vmatprep.mubr.bf16.mxu0 (!%p1114_p9), %v1495_v4  ;;  %v1670_v19 = vmov (!%p1114_p9), 1.0|1.0  }
  0x6c   : > { %v1867_v3 = vshrl.u32 (!%p1114_p9), %v301_v1, 7 }
  0x6e   : > { %v372_v6 = vsub.s32 (!%p1114_p9), 1, %v1867_v3  ;;  %v368_v7 = vsub.s32 (!%p1114_p9), 0, %v1867_v3  ;;  %v303_v10 = vadd.s32 (!%p1114_p9), 8, %v1867_v3  ;;  %v334_v11 = vadd.s32 (!%p1114_p9), 256, %v1867_v3 }
  0x6f   : > { %v335_v12 = vadd.s32 (!%p1114_p9), 264, %v1867_v3  ;;  %v304_v15 = vadd.s32 (!%p1114_p9), 16, %v1867_v3  ;;  %v305_v16 = vadd.s32 (!%p1114_p9), 24, %v1867_v3  ;;  %v336_v17 = vadd.s32 (!%p1114_p9), 272, %v1867_v3 }
  0x70   : > { %s1116_s21 = sshll.u32 (!%p1114_p9), %s296_s20, 9  ;;  %v337_v18 = vadd.s32 (!%p1114_p9), 280, %v1867_v3  ;;  %v306_v20 = vadd.s32 (!%p1114_p9), 32, %v1867_v3  ;;  %v307_v21 = vadd.s32 (!%p1114_p9), 40, %v1867_v3  ;;  %v338_v22 = vadd.s32 (!%p1114_p9), 288, %v1867_v3 }
  0x71   : > { %v299_v8 = vstv (!%p1114_p9), %s1116_s21  ;;  %v339_v23 = vadd.s32 (!%p1114_p9), 296, %v1867_v3  ;;  %v308_v24 = vadd.s32 (!%p1114_p9), 48, %v1867_v3  ;;  %v309_v25 = vadd.s32 (!%p1114_p9), 56, %v1867_v3 }
  0x72   : > { %v300_v9 = vsub.s32 %v297_v5, %v299_v8  ;;  %v340_v26 = vadd.s32 304, %v1867_v3  ;;  %v341_v27 = vadd.s32 312, %v1867_v3  ;;  %v310_v28 = vadd.s32 64, %v1867_v3 }
  0x73   : > { %v311_v29 = vadd.s32 72, %v1867_v3  ;;  %v342_v30 = vadd.s32 320, %v1867_v3  ;;  %v343_v31 = vadd.s32 328, %v1867_v3  ;;  %v312_v32 = vadd.s32 80, %v1867_v3 }
  0x74   : > { %v1875_v13 = vrot.slane %v300_v9, %v372_v6  ;;  %v1877_v14 = vrot.slane %v300_v9, %v368_v7  ;;  %v313_v33 = vadd.s32 88, %v1867_v3  ;;  %v344_v34 = vadd.s32 336, %v1867_v3 }
  0x75   : > { %v345_v35 = vadd.s32 344, %v1867_v3  ;;  %v314_v36 = vadd.s32 96, %v1867_v3  ;;  %v315_v37 = vadd.s32 104, %v1867_v3  ;;  %v346_v38 = vadd.s32 352, %v1867_v3 }
  0x76   : > { %vm375_vm0 = vcmp.eq.s32.totalorder %v1867_v3, %v1875_v13  ;;  %vm377_vm1 = vcmp.eq.s32.totalorder %v303_v10, %v1875_v13  ;;  %vm439_vm2 = vcmp.eq.s32.totalorder %v334_v11, %v1875_v13  ;;  %vm441_vm3 = vcmp.eq.s32.totalorder %v335_v12, %v1875_v13 }
  0x77   : > { %vm1253_vm4 = vmpackc.low %vm377_vm1, %vm375_vm0  ;;  %vm374_vm5 = vcmp.eq.s32.totalorder %v1867_v3, %v1877_v14  ;;  %vm376_vm6 = vcmp.eq.s32.totalorder %v303_v10, %v1877_v14  ;;  %vm438_vm7 = vcmp.eq.s32.totalorder %v334_v11, %v1877_v14  ;;  %vm440_vm8 = vcmp.eq.s32.totalorder %v335_v12, %v1877_v14 }
  0x78   : > { %1254 = vmatprep.subr.msk.bf16.mxu1 %vm1253_vm4, %v1670_v19  ;;  %vm1317_vm9 = vmpackc.low %vm441_vm3, %vm439_vm2  ;;  %vm379_vm10 = vcmp.eq.s32.totalorder %v304_v15, %v1875_v13  ;;  %vm381_vm11 = vcmp.eq.s32.totalorder %v305_v16, %v1875_v13  ;;  %vm443_vm13 = vcmp.eq.s32.totalorder %v336_v17, %v1875_v13  ;;  %vm445_vm14 = vcmp.eq.s32.totalorder %v337_v18, %v1875_v13 }
  0x79   : > { %1318 = vmatprep.subr.msk.bf16.mxu0 %vm1317_vm9, %v1670_v19  ;;  %vm1255_vm12 = vmpackc.low %vm376_vm6, %vm374_vm5  ;;  %vm378_vm0 = vcmp.eq.s32.totalorder %v304_v15, %v1877_v14  ;;  %vm380_vm1 = vcmp.eq.s32.totalorder %v305_v16, %v1877_v14  ;;  %vm442_vm3 = vcmp.eq.s32.totalorder %v336_v17, %v1877_v14  ;;  %vm444_vm4 = vcmp.eq.s32.totalorder %v337_v18, %v1877_v14  ;;  %v1490_v15 = vld [vmem:[%s1849_s12] ss:$16 sps:$4 sm:$0xff]   ;;  %v1493_v16 = vld [vmem:[%s1849_s12 + $0x8] ss:$16 sps:$4 sm:$0xff]  }
  0x7a   : > { %1256 = vmatpush1.bf16.msk.msra.mxu1 %vm1255_vm12, %v1670_v19  ;;  %vm1319_vm15 = vmpackc.low %vm440_vm8, %vm438_vm7  ;;  %vm383_vm6 = vcmp.eq.s32.totalorder %v306_v20, %v1875_v13  ;;  %vm385_vm7 = vcmp.eq.s32.totalorder %v307_v21, %v1875_v13  ;;  %vm447_vm9 = vcmp.eq.s32.totalorder %v338_v22, %v1875_v13  ;;  %vm382_vm12 = vcmp.eq.s32.totalorder %v306_v20, %v1877_v14 }
  0x7b   : > { %1320 = vmatpush1.bf16.msk.msra.mxu0 %vm1319_vm15, %v1670_v19  ;;  %vm1257_vm2 = vmpackc.low %vm381_vm11, %vm379_vm10  ;;  %vm449_vm10 = vcmp.eq.s32.totalorder %v339_v23, %v1875_v13  ;;  %vm446_vm15 = vcmp.eq.s32.totalorder %v338_v22, %v1877_v14  ;;  %v347_v39 = vadd.s32 360, %v1867_v3  ;;  %v316_v40 = vadd.s32 112, %v1867_v3 }
  0x7c   : > { %1258 = vmatprep.subr.msk.bf16.mxu1 %vm1257_vm2, %v1670_v19  ;;  %vm1321_vm5 = vmpackc.low %vm445_vm14, %vm443_vm13  ;;  %vm384_vm13 = vcmp.eq.s32.totalorder %v307_v21, %v1877_v14  ;;  %vm387_vm2 = vcmp.eq.s32.totalorder %v308_v24, %v1875_v13  ;;  %v317_v41 = vadd.s32 120, %v1867_v3  ;;  %v348_v42 = vadd.s32 368, %v1867_v3 }
  0x7d   : > { %1322 = vmatprep.subr.msk.bf16.mxu0 %vm1321_vm5, %v1670_v19  ;;  %vm1259_vm8 = vmpackc.low %vm380_vm1, %vm378_vm0  ;;  %vm448_vm0 = vcmp.eq.s32.totalorder %v339_v23, %v1877_v14  ;;  %vm451_vm5 = vcmp.eq.s32.totalorder %v340_v26, %v1875_v13  ;;  %v349_v43 = vadd.s32 376, %v1867_v3  ;;  %v318_v44 = vadd.s32 128, %v1867_v3 }
  0x7e   : > { %1260 = vmatpush1.bf16.msk.msra.mxu1 %vm1259_vm8, %v1670_v19  ;;  %vm1323_vm11 = vmpackc.low %vm444_vm4, %vm442_vm3  ;;  %vm389_vm3 = vcmp.eq.s32.totalorder %v309_v25, %v1875_v13  ;;  %vm386_vm8 = vcmp.eq.s32.totalorder %v308_v24, %v1877_v14  ;;  %v319_v45 = vadd.s32 136, %v1867_v3  ;;  %v350_v46 = vadd.s32 384, %v1867_v3 }
  0x7f   : > { %1324 = vmatpush1.bf16.msk.msra.mxu0 %vm1323_vm11, %v1670_v19  ;;  %vm1261_vm14 = vmpackc.low %vm385_vm7, %vm383_vm6  ;;  %vm453_vm6 = vcmp.eq.s32.totalorder %v341_v27, %v1875_v13  ;;  %vm450_vm11 = vcmp.eq.s32.totalorder %v340_v26, %v1877_v14  ;;  %v351_v47 = vadd.s32 392, %v1867_v3  ;;  %v320_v48 = vadd.s32 144, %v1867_v3 }
  0x80   : > { %1262 = vmatprep.subr.msk.bf16.mxu1 %vm1261_vm14, %v1670_v19  ;;  %vm1325_vm1 = vmpackc.low %vm449_vm10, %vm447_vm9  ;;  %vm388_vm9 = vcmp.eq.s32.totalorder %v309_v25, %v1877_v14  ;;  %vm391_vm14 = vcmp.eq.s32.totalorder %v310_v28, %v1875_v13  ;;  %v321_v49 = vadd.s32 152, %v1867_v3  ;;  %v352_v50 = vadd.s32 400, %v1867_v3 }
  0x81   : > { %1326 = vmatprep.subr.msk.bf16.mxu0 %vm1325_vm1, %v1670_v19  ;;  %vm1263_vm4 = vmpackc.low %vm384_vm13, %vm382_vm12  ;;  %vm452_vm12 = vcmp.eq.s32.totalorder %v341_v27, %v1877_v14  ;;  %vm455_vm1 = vcmp.eq.s32.totalorder %v342_v30, %v1875_v13  ;;  %v353_v51 = vadd.s32 408, %v1867_v3  ;;  %v322_v52 = vadd.s32 160, %v1867_v3 }
  0x82   : > { %1264 = vmatpush1.bf16.msk.msra.mxu1 %vm1263_vm4, %v1670_v19  ;;  %vm1327_vm7 = vmpackc.low %vm448_vm0, %vm446_vm15  ;;  %vm393_vm15 = vcmp.eq.s32.totalorder %v311_v29, %v1875_v13  ;;  %vm390_vm4 = vcmp.eq.s32.totalorder %v310_v28, %v1877_v14  ;;  %v323_v53 = vadd.s32 168, %v1867_v3  ;;  %v354_v54 = vadd.s32 416, %v1867_v3 }
  0x83   : > { %1328 = vmatpush1.bf16.msk.msra.mxu0 %vm1327_vm7, %v1670_v19  ;;  %vm1265_vm10 = vmpackc.low %vm389_vm3, %vm387_vm2  ;;  %vm457_vm2 = vcmp.eq.s32.totalorder %v343_v31, %v1875_v13  ;;  %vm454_vm7 = vcmp.eq.s32.totalorder %v342_v30, %v1877_v14  ;;  %v355_v55 = vadd.s32 424, %v1867_v3  ;;  %v324_v56 = vadd.s32 176, %v1867_v3 }
  0x84   : > { %1266 = vmatprep.subr.msk.bf16.mxu1 %vm1265_vm10, %v1670_v19  ;;  %vm1329_vm13 = vmpackc.low %vm453_vm6, %vm451_vm5  ;;  %vm392_vm5 = vcmp.eq.s32.totalorder %v311_v29, %v1877_v14  ;;  %vm395_vm10 = vcmp.eq.s32.totalorder %v312_v32, %v1875_v13  ;;  %v325_v57 = vadd.s32 184, %v1867_v3  ;;  %v356_v58 = vadd.s32 432, %v1867_v3 }
  0x85   : > { %1330 = vmatprep.subr.msk.bf16.mxu0 %vm1329_vm13, %v1670_v19  ;;  %vm1267_vm0 = vmpackc.low %vm388_vm9, %vm386_vm8  ;;  %vm456_vm8 = vcmp.eq.s32.totalorder %v343_v31, %v1877_v14  ;;  %vm459_vm13 = vcmp.eq.s32.totalorder %v344_v34, %v1875_v13  ;;  %v357_v59 = vadd.s32 440, %v1867_v3  ;;  %v326_v60 = vadd.s32 192, %v1867_v3 }
  0x86   : > { %1268 = vmatpush1.bf16.msk.msra.mxu1 %vm1267_vm0, %v1670_v19  ;;  %vm1331_vm3 = vmpackc.low %vm452_vm12, %vm450_vm11  ;;  %vm397_vm11 = vcmp.eq.s32.totalorder %v313_v33, %v1875_v13  ;;  %vm394_vm0 = vcmp.eq.s32.totalorder %v312_v32, %v1877_v14  ;;  %v327_v61 = vadd.s32 200, %v1867_v3  ;;  %v358_v62 = vadd.s32 448, %v1867_v3 }
  0x87   : > { %1332 = vmatpush1.bf16.msk.msra.mxu0 %vm1331_vm3, %v1670_v19  ;;  %vm1269_vm6 = vmpackc.low %vm393_vm15, %vm391_vm14  ;;  %vm461_vm14 = vcmp.eq.s32.totalorder %v345_v35, %v1875_v13  ;;  %vm458_vm3 = vcmp.eq.s32.totalorder %v344_v34, %v1877_v14  ;;  %v359_v63 = vadd.s32 456, %v1867_v3  ;;  %v328_v0 = vadd.s32 208, %v1867_v3 }
  0x88   : > { %1270 = vmatprep.subr.msk.bf16.mxu1 %vm1269_vm6, %v1670_v19  ;;  %vm1333_vm9 = vmpackc.low %vm457_vm2, %vm455_vm1  ;;  %vm396_vm1 = vcmp.eq.s32.totalorder %v313_v33, %v1877_v14  ;;  %vm399_vm6 = vcmp.eq.s32.totalorder %v314_v36, %v1875_v13  ;;  %v329_v1 = vadd.s32 216, %v1867_v3  ;;  %v360_v2 = vadd.s32 464, %v1867_v3 }
  0x89   : > { %1334 = vmatprep.subr.msk.bf16.mxu0 %vm1333_vm9, %v1670_v19  ;;  %vm1271_vm12 = vmpackc.low %vm392_vm5, %vm390_vm4  ;;  %vm460_vm4 = vcmp.eq.s32.totalorder %v345_v35, %v1877_v14  ;;  %vm463_vm9 = vcmp.eq.s32.totalorder %v346_v38, %v1875_v13  ;;  %v361_v4 = vadd.s32 472, %v1867_v3  ;;  %v330_v5 = vadd.s32 224, %v1867_v3 }
  0x8a   : > { %1272 = vmatpush1.bf16.msk.msra.mxu1 %vm1271_vm12, %v1670_v19  ;;  %vm1335_vm15 = vmpackc.low %vm456_vm8, %vm454_vm7  ;;  %vm401_vm7 = vcmp.eq.s32.totalorder %v315_v37, %v1875_v13  ;;  %vm398_vm12 = vcmp.eq.s32.totalorder %v314_v36, %v1877_v14  ;;  %v331_v6 = vadd.s32 232, %v1867_v3  ;;  %v362_v7 = vadd.s32 480, %v1867_v3 }
  0x8b   : > { %1336 = vmatpush1.bf16.msk.msra.mxu0 %vm1335_vm15, %v1670_v19  ;;  %vm1273_vm2 = vmpackc.low %vm397_vm11, %vm395_vm10  ;;  %vm465_vm10 = vcmp.eq.s32.totalorder %v347_v39, %v1875_v13  ;;  %vm462_vm15 = vcmp.eq.s32.totalorder %v346_v38, %v1877_v14  ;;  %v363_v8 = vadd.s32 488, %v1867_v3  ;;  %v332_v9 = vadd.s32 240, %v1867_v3 }
  0x8c   : > { %1274 = vmatprep.subr.msk.bf16.mxu1 %vm1273_vm2, %v1670_v19  ;;  %vm1337_vm5 = vmpackc.low %vm461_vm14, %vm459_vm13  ;;  %vm400_vm13 = vcmp.eq.s32.totalorder %v315_v37, %v1877_v14  ;;  %vm403_vm2 = vcmp.eq.s32.totalorder %v316_v40, %v1875_v13  ;;  %v333_v10 = vadd.s32 248, %v1867_v3  ;;  %v364_v11 = vadd.s32 496, %v1867_v3 }
  0x8d   : > { %1338 = vmatprep.subr.msk.bf16.mxu0 %vm1337_vm5, %v1670_v19  ;;  %vm1275_vm8 = vmpackc.low %vm396_vm1, %vm394_vm0  ;;  %vm464_vm0 = vcmp.eq.s32.totalorder %v347_v39, %v1877_v14  ;;  %vm467_vm5 = vcmp.eq.s32.totalorder %v348_v42, %v1875_v13  ;;  %v365_v12 = vadd.s32 504, %v1867_v3  ;;  %v826_v3 = vld [vmem:[%s1849_s12 + $0x20] sm:$0xff] }
  0x8e   : > { %1276 = vmatpush1.bf16.msk.msra.mxu1 %vm1275_vm8, %v1670_v19  ;;  %vm1339_vm11 = vmpackc.low %vm460_vm4, %vm458_vm3  ;;  %vm405_vm3 = vcmp.eq.s32.totalorder %v317_v41, %v1875_v13  ;;  %vm402_vm8 = vcmp.eq.s32.totalorder %v316_v40, %v1877_v14  ;;  %v1250_v17 = vcombine.high %v826_v3, %v826_v3  ;;  %v964_v40 = vld [vmem:[#allocation2] sm:$0xff] }
  0x8f   : > { %1340 = vmatpush1.bf16.msk.msra.mxu0 %vm1339_vm11, %v1670_v19  ;;  %vm1277_vm14 = vmpackc.low %vm401_vm7, %vm399_vm6  ;;  %vm469_vm6 = vcmp.eq.s32.totalorder %v349_v43, %v1875_v13  ;;  %vm466_vm11 = vcmp.eq.s32.totalorder %v348_v42, %v1877_v14 }
  0x90   : > { %1278 = vmatprep.subr.msk.bf16.mxu1 %vm1277_vm14, %v1670_v19  ;;  %vm1341_vm1 = vmpackc.low %vm465_vm10, %vm463_vm9  ;;  %vm404_vm9 = vcmp.eq.s32.totalorder %v317_v41, %v1877_v14  ;;  %vm407_vm14 = vcmp.eq.s32.totalorder %v318_v44, %v1875_v13 }
  0x91   : > { %1342 = vmatprep.subr.msk.bf16.mxu0 %vm1341_vm1, %v1670_v19  ;;  %vm1279_vm4 = vmpackc.low %vm400_vm13, %vm398_vm12  ;;  %vm468_vm12 = vcmp.eq.s32.totalorder %v349_v43, %v1877_v14  ;;  %vm471_vm1 = vcmp.eq.s32.totalorder %v350_v46, %v1875_v13 }
  0x92   : > { %1280 = vmatpush1.bf16.msk.msra.mxu1 %vm1279_vm4, %v1670_v19  ;;  %vm1343_vm7 = vmpackc.low %vm464_vm0, %vm462_vm15  ;;  %vm409_vm15 = vcmp.eq.s32.totalorder %v319_v45, %v1875_v13  ;;  %vm406_vm4 = vcmp.eq.s32.totalorder %v318_v44, %v1877_v14 }
  0x93   : > { %1344 = vmatpush1.bf16.msk.msra.mxu0 %vm1343_vm7, %v1670_v19  ;;  %vm1281_vm10 = vmpackc.low %vm405_vm3, %vm403_vm2  ;;  %vm473_vm2 = vcmp.eq.s32.totalorder %v351_v47, %v1875_v13  ;;  %vm470_vm7 = vcmp.eq.s32.totalorder %v350_v46, %v1877_v14 }
  0x94   : > { %1282 = vmatprep.subr.msk.bf16.mxu1 %vm1281_vm10, %v1670_v19  ;;  %vm1345_vm13 = vmpackc.low %vm469_vm6, %vm467_vm5  ;;  %vm408_vm5 = vcmp.eq.s32.totalorder %v319_v45, %v1877_v14  ;;  %vm411_vm10 = vcmp.eq.s32.totalorder %v320_v48, %v1875_v13  ;;  %v965_v45 = vld [vmem:[#allocation2 + $0x8] sm:$0xff] }
  0x95   : > { %1346 = vmatprep.subr.msk.bf16.mxu0 %vm1345_vm13, %v1670_v19  ;;  %vm1283_vm0 = vmpackc.low %vm404_vm9, %vm402_vm8  ;;  %vm472_vm8 = vcmp.eq.s32.totalorder %v351_v47, %v1877_v14  ;;  %vm475_vm13 = vcmp.eq.s32.totalorder %v352_v50, %v1875_v13 }
  0x96   : > { %1284 = vmatpush1.bf16.msk.msra.mxu1 %vm1283_vm0, %v1670_v19  ;;  %vm1347_vm3 = vmpackc.low %vm468_vm12, %vm466_vm11  ;;  %vm413_vm11 = vcmp.eq.s32.totalorder %v321_v49, %v1875_v13  ;;  %vm410_vm0 = vcmp.eq.s32.totalorder %v320_v48, %v1877_v14 }
  0x97   : > { %1348 = vmatpush1.bf16.msk.msra.mxu0 %vm1347_vm3, %v1670_v19  ;;  %vm1285_vm6 = vmpackc.low %vm409_vm15, %vm407_vm14  ;;  %vm477_vm14 = vcmp.eq.s32.totalorder %v353_v51, %v1875_v13  ;;  %vm474_vm3 = vcmp.eq.s32.totalorder %v352_v50, %v1877_v14 }
  0x98   : > { %1286 = vmatprep.subr.msk.bf16.mxu1 %vm1285_vm6, %v1670_v19  ;;  %vm1349_vm9 = vmpackc.low %vm473_vm2, %vm471_vm1  ;;  %vm412_vm1 = vcmp.eq.s32.totalorder %v321_v49, %v1877_v14  ;;  %vm415_vm6 = vcmp.eq.s32.totalorder %v322_v52, %v1875_v13 }
  0x99   : > { %1350 = vmatprep.subr.msk.bf16.mxu0 %vm1349_vm9, %v1670_v19  ;;  %vm1287_vm12 = vmpackc.low %vm408_vm5, %vm406_vm4  ;;  %vm476_vm4 = vcmp.eq.s32.totalorder %v353_v51, %v1877_v14  ;;  %vm479_vm9 = vcmp.eq.s32.totalorder %v354_v54, %v1875_v13 }
  0x9a   : > { %1288 = vmatpush1.bf16.msk.msra.mxu1 %vm1287_vm12, %v1670_v19  ;;  %vm1351_vm15 = vmpackc.low %vm472_vm8, %vm470_vm7  ;;  %vm417_vm7 = vcmp.eq.s32.totalorder %v323_v53, %v1875_v13  ;;  %vm414_vm12 = vcmp.eq.s32.totalorder %v322_v52, %v1877_v14 }
  0x9b   : > { %1352 = vmatpush1.bf16.msk.msra.mxu0 %vm1351_vm15, %v1670_v19  ;;  %vm1289_vm2 = vmpackc.low %vm413_vm11, %vm411_vm10  ;;  %vm481_vm10 = vcmp.eq.s32.totalorder %v355_v55, %v1875_v13  ;;  %vm478_vm15 = vcmp.eq.s32.totalorder %v354_v54, %v1877_v14 }
  0x9c   : > { %1290 = vmatprep.subr.msk.bf16.mxu1 %vm1289_vm2, %v1670_v19  ;;  %vm1353_vm5 = vmpackc.low %vm477_vm14, %vm475_vm13  ;;  %vm416_vm13 = vcmp.eq.s32.totalorder %v323_v53, %v1877_v14  ;;  %vm419_vm2 = vcmp.eq.s32.totalorder %v324_v56, %v1875_v13 }
  0x9d   : > { %1354 = vmatprep.subr.msk.bf16.mxu0 %vm1353_vm5, %v1670_v19  ;;  %vm1291_vm8 = vmpackc.low %vm412_vm1, %vm410_vm0  ;;  %vm480_vm0 = vcmp.eq.s32.totalorder %v355_v55, %v1877_v14  ;;  %vm483_vm5 = vcmp.eq.s32.totalorder %v356_v58, %v1875_v13 }
  0x9e   : > { %1292 = vmatpush1.bf16.msk.msra.mxu1 %vm1291_vm8, %v1670_v19  ;;  %vm1355_vm11 = vmpackc.low %vm476_vm4, %vm474_vm3  ;;  %vm421_vm3 = vcmp.eq.s32.totalorder %v325_v57, %v1875_v13  ;;  %vm418_vm8 = vcmp.eq.s32.totalorder %v324_v56, %v1877_v14 }
  0x9f   : > { %1356 = vmatpush1.bf16.msk.msra.mxu0 %vm1355_vm11, %v1670_v19  ;;  %vm1293_vm14 = vmpackc.low %vm417_vm7, %vm415_vm6  ;;  %vm485_vm6 = vcmp.eq.s32.totalorder %v357_v59, %v1875_v13  ;;  %vm482_vm11 = vcmp.eq.s32.totalorder %v356_v58, %v1877_v14 }
  0xa0   : > { %1294 = vmatprep.subr.msk.bf16.mxu1 %vm1293_vm14, %v1670_v19  ;;  %vm1357_vm1 = vmpackc.low %vm481_vm10, %vm479_vm9  ;;  %vm420_vm9 = vcmp.eq.s32.totalorder %v325_v57, %v1877_v14  ;;  %vm423_vm14 = vcmp.eq.s32.totalorder %v326_v60, %v1875_v13 }
  0xa1   : > { %1358 = vmatprep.subr.msk.bf16.mxu0 %vm1357_vm1, %v1670_v19  ;;  %vm1295_vm4 = vmpackc.low %vm416_vm13, %vm414_vm12  ;;  %vm484_vm12 = vcmp.eq.s32.totalorder %v357_v59, %v1877_v14  ;;  %vm487_vm1 = vcmp.eq.s32.totalorder %v358_v62, %v1875_v13 }
  0xa2   : > { %1296 = vmatpush1.bf16.msk.msra.mxu1 %vm1295_vm4, %v1670_v19  ;;  %vm1359_vm7 = vmpackc.low %vm480_vm0, %vm478_vm15  ;;  %vm425_vm15 = vcmp.eq.s32.totalorder %v327_v61, %v1875_v13  ;;  %vm422_vm4 = vcmp.eq.s32.totalorder %v326_v60, %v1877_v14 }
  0xa3   : > { %1360 = vmatpush1.bf16.msk.msra.mxu0 %vm1359_vm7, %v1670_v19  ;;  %vm1297_vm10 = vmpackc.low %vm421_vm3, %vm419_vm2  ;;  %vm489_vm2 = vcmp.eq.s32.totalorder %v359_v63, %v1875_v13  ;;  %vm486_vm7 = vcmp.eq.s32.totalorder %v358_v62, %v1877_v14 }
  0xa4   : > { %1298 = vmatprep.subr.msk.bf16.mxu1 %vm1297_vm10, %v1670_v19  ;;  %vm1361_vm13 = vmpackc.low %vm485_vm6, %vm483_vm5  ;;  %vm424_vm5 = vcmp.eq.s32.totalorder %v327_v61, %v1877_v14  ;;  %vm427_vm10 = vcmp.eq.s32.totalorder %v328_v0, %v1875_v13 }
  0xa5   : > { %1362 = vmatprep.subr.msk.bf16.mxu0 %vm1361_vm13, %v1670_v19  ;;  %vm1299_vm0 = vmpackc.low %vm420_vm9, %vm418_vm8  ;;  %vm488_vm8 = vcmp.eq.s32.totalorder %v359_v63, %v1877_v14  ;;  %vm491_vm13 = vcmp.eq.s32.totalorder %v360_v2, %v1875_v13 }
  0xa6   : > { %1300 = vmatpush1.bf16.msk.msra.mxu1 %vm1299_vm0, %v1670_v19  ;;  %vm1363_vm3 = vmpackc.low %vm484_vm12, %vm482_vm11  ;;  %vm429_vm11 = vcmp.eq.s32.totalorder %v329_v1, %v1875_v13  ;;  %vm426_vm0 = vcmp.eq.s32.totalorder %v328_v0, %v1877_v14 }
  0xa7   : > { %1364 = vmatpush1.bf16.msk.msra.mxu0 %vm1363_vm3, %v1670_v19  ;;  %vm1301_vm6 = vmpackc.low %vm425_vm15, %vm423_vm14  ;;  %vm493_vm14 = vcmp.eq.s32.totalorder %v361_v4, %v1875_v13  ;;  %vm490_vm3 = vcmp.eq.s32.totalorder %v360_v2, %v1877_v14 }
  0xa8   : > { %1302 = vmatprep.subr.msk.bf16.mxu1 %vm1301_vm6, %v1670_v19  ;;  %vm1365_vm9 = vmpackc.low %vm489_vm2, %vm487_vm1  ;;  %vm428_vm1 = vcmp.eq.s32.totalorder %v329_v1, %v1877_v14  ;;  %vm431_vm6 = vcmp.eq.s32.totalorder %v330_v5, %v1875_v13 }
  0xa9   : > { %1366 = vmatprep.subr.msk.bf16.mxu0 %vm1365_vm9, %v1670_v19  ;;  %vm1303_vm12 = vmpackc.low %vm424_vm5, %vm422_vm4  ;;  %vm492_vm4 = vcmp.eq.s32.totalorder %v361_v4, %v1877_v14  ;;  %vm495_vm9 = vcmp.eq.s32.totalorder %v362_v7, %v1875_v13 }
  0xaa   : > { %1304 = vmatpush1.bf16.msk.msra.mxu1 %vm1303_vm12, %v1670_v19  ;;  %vm1367_vm15 = vmpackc.low %vm488_vm8, %vm486_vm7  ;;  %vm433_vm7 = vcmp.eq.s32.totalorder %v331_v6, %v1875_v13  ;;  %vm430_vm12 = vcmp.eq.s32.totalorder %v330_v5, %v1877_v14 }
  0xab   : > { %1368 = vmatpush1.bf16.msk.msra.mxu0 %vm1367_vm15, %v1670_v19  ;;  %vm1305_vm2 = vmpackc.low %vm429_vm11, %vm427_vm10  ;;  %vm497_vm10 = vcmp.eq.s32.totalorder %v363_v8, %v1875_v13  ;;  %vm494_vm15 = vcmp.eq.s32.totalorder %v362_v7, %v1877_v14 }
  0xac   : > { %1306 = vmatprep.subr.msk.bf16.mxu1 %vm1305_vm2, %v1670_v19  ;;  %vm1369_vm5 = vmpackc.low %vm493_vm14, %vm491_vm13  ;;  %vm432_vm13 = vcmp.eq.s32.totalorder %v331_v6, %v1877_v14  ;;  %vm435_vm2 = vcmp.eq.s32.totalorder %v332_v9, %v1875_v13 }
  0xad   : > { %1370 = vmatprep.subr.msk.bf16.mxu0 %vm1369_vm5, %v1670_v19  ;;  %vm1307_vm8 = vmpackc.low %vm428_vm1, %vm426_vm0  ;;  %vm496_vm0 = vcmp.eq.s32.totalorder %v363_v8, %v1877_v14  ;;  %vm499_vm5 = vcmp.eq.s32.totalorder %v364_v11, %v1875_v13 }
  0xae   : > { %1308 = vmatpush1.bf16.msk.msra.mxu1 %vm1307_vm8, %v1670_v19  ;;  %vm1371_vm11 = vmpackc.low %vm492_vm4, %vm490_vm3  ;;  %vm437_vm3 = vcmp.eq.s32.totalorder %v333_v10, %v1875_v13  ;;  %vm434_vm8 = vcmp.eq.s32.totalorder %v332_v9, %v1877_v14 }
  0xaf   : > { %1372 = vmatpush1.bf16.msk.msra.mxu0 %vm1371_vm11, %v1670_v19  ;;  %vm1309_vm14 = vmpackc.low %vm433_vm7, %vm431_vm6  ;;  %vm501_vm6 = vcmp.eq.s32.totalorder %v365_v12, %v1875_v13  ;;  %vm498_vm11 = vcmp.eq.s32.totalorder %v364_v11, %v1877_v14  ;;  %v827_v13 = vld [vmem:[%s1849_s12 + $0x28] sm:$0xff] }
  0xb0   : > { %1310 = vmatprep.subr.msk.bf16.mxu1 %vm1309_vm14, %v1670_v19  ;;  %vm1373_vm1 = vmpackc.low %vm497_vm10, %vm495_vm9  ;;  %vm436_vm9 = vcmp.eq.s32.totalorder %v333_v10, %v1877_v14  ;;  %v1252_v18 = vcombine.high %v827_v13, %v827_v13  ;;  %v1251_v20 = vcombine.low %v827_v13, %v827_v13 }
  0xb1   : > { %1374 = vmatprep.subr.msk.bf16.mxu0 %vm1373_vm1, %v1670_v19  ;;  %vm1311_vm4 = vmpackc.low %vm432_vm13, %vm430_vm12  ;;  %vm500_vm12 = vcmp.eq.s32.totalorder %v365_v12, %v1877_v14  ;;  %v1249_v14 = vcombine.low %v826_v3, %v826_v3 }
  0xb2   : > { %1312 = vmatpush1.bf16.msk.msra.mxu1 %vm1311_vm4, %v1670_v19  ;;  %vm1375_vm7 = vmpackc.low %vm496_vm0, %vm494_vm15 }
  0xb3   : > { %1376 = vmatpush1.bf16.msk.msra.mxu0 %vm1375_vm7, %v1670_v19  ;;  %vm1313_vm10 = vmpackc.low %vm437_vm3, %vm435_vm2 }
  0xb4   : > { %1314 = vmatprep.subr.msk.bf16.mxu1 %vm1313_vm10, %v1670_v19  ;;  %vm1377_vm13 = vmpackc.low %vm501_vm6, %vm499_vm5 }
  0xb5   : > { %1378 = vmatprep.subr.msk.bf16.mxu0 %vm1377_vm13, %v1670_v19  ;;  %vm1315_vm14 = vmpackc.low %vm436_vm9, %vm434_vm8 }
  0xb6   : > { %1316 = vmatpush1.bf16.msk.msra.mxu1 %vm1315_vm14, %v1670_v19  ;;  %vm1379_vm15 = vmpackc.low %vm500_vm12, %vm498_vm11 }
  0xb7   : > { %1380 = vmatpush1.bf16.msk.msra.mxu0 %vm1379_vm15, %v1670_v19 }
  0xb9   : > { %895 = vmatmul.mubr.bf16.vlgmr.msra.gmra.mrb[0].mxu1 %v1490_v15 }
  0xba   : > { %946 = vmatmul.mubr.bf16.vlgmr.msra.gmra.mrb[0].mxu0 %v1493_v16  ;;  %904 = vmatprep.mubr.bf16.mxu1 %v1250_v17 }
  0xbb   : > { %955 = vmatprep.mubr.bf16.mxu0 %v1252_v18 }
  0xc1   : > { %905 = vmatmul.mubr.bf16.gmra.mrb[4].mxu1 %v1249_v14 }
  0xc2   : > { %956 = vmatmul.mubr.bf16.gmra.mrb[4].mxu0 %v1251_v20 }
 0x18c   : > { %v896_v21 = vpop.f32.mrb[0].mxu1 }
 0x18d   : > { %v947_v22 = vpop.f32.mrb[0].mxu0  ;;  %v898_v23 = vpop.f32.mrb[1].mxu1 }
 0x18e   : > { %v948_v24 = vadd.f32 %v947_v22, %v896_v21  ;;  %v949_v25 = vpop.f32.mrb[1].mxu0  ;;  %v900_v26 = vpop.f32.mrb[2].mxu1 }
 0x18f   : > { %v950_v27 = vadd.f32 %v949_v25, %v898_v23  ;;  %v951_v28 = vpop.f32.mrb[2].mxu0  ;;  %v902_v29 = vpop.f32.mrb[3].mxu1 }
 0x190   : > { %v952_v30 = vadd.f32 %v951_v28, %v900_v26  ;;  %v953_v19 = vpop.f32.mrb[3].mxu0 }
 0x191   : > { %v954_v31 = vadd.f32 %v953_v19, %v902_v29 }
 0x192   : > { %v966_v32 = vadd.f32 %v952_v30, %v948_v24 }
 0x193   : > { %v967_v33 = vadd.f32 %v954_v31, %v950_v27 }
 0x194   : > { %v906_v34 = vpop.f32.mrb[4].mxu1 }
 0x195   : > { %v957_v35 = vpop.f32.mrb[4].mxu0  ;;  %v908_v36 = vpop.f32.mrb[5].mxu1 }
 0x196   : > { %v958_v37 = vadd.f32 %v957_v35, %v906_v34  ;;  %v959_v38 = vpop.f32.mrb[5].mxu0  ;;  %v910_v39 = vpop.f32.mrb[6].mxu1 }
 0x197   : > { %v960_v41 = vadd.f32 %v959_v38, %v908_v36  ;;  %v961_v42 = vpop.f32.mrb[6].mxu0  ;;  %v911_v43 = vpop.f32.mrb[7].mxu1 }
 0x198   : > { %v968_v44 = vadd.f32 %v966_v32, %v958_v37  ;;  %v962_v46 = vpop.f32.mrb[7].mxu0 }
 0x199   : > { %v969_v47 = vadd.f32 %v967_v33, %v960_v41 }
 0x19a   : > { %v970_v48 = vadd.f32 %v968_v44, %v964_v40 }
 0x19b   : > { %v971_v49 = vadd.f32 %v969_v47, %v965_v45 }
 0x19c   : > { %972 = vst [vmem:[#allocation2] sm:$0xff] %v970_v48 }
 0x19d   : > { %973 = vst [vmem:[#allocation2 + $0x8] sm:$0xff] %v971_v49 }
 0x19e PF: > { %s1386_s26 = sshll.u32 %s1654_s29, 8  ;;  %s998_s12 = sshll.u32 %s1864_s15, 4  ;;  %s999_s12 = int_to_ptr.vmem [resolvable:$true] %s998_s12 }
 0x19f   : > { %s2201_s8 = scalar_lea.hbm %s2258_s4, %s1386_s26  ;;  %s982_s0 = scalar_lea.sflag [#allocation8], %s247_s7 }
 0x1a0   : > { %s1554_s11 = scalar_lea.vmem %s999_s12, 256  ;;  %p2272_p13 = scmp.ne.s32.totalorder %s2266_s19, 0 }
 0x1a1   : > { %p1555_p11 = scmp.ne.s32.totalorder %s999_s12, %s1554_s11  ;;  %s1671_s14 = smov [#allocation9]  }
 0x1a2   : > { %s1558_s9 = sshll.u32 %s1671_s14, 4  ;;  %s1559_s9 = int_to_ptr.vmem [resolvable:$false] %s1558_s9 }
 0x1a3   : > { %v977_v50 = vld [vmem:[#allocation2] sm:$0xff]  ;;  %p1556_p3 = pnand %p1555_p11, %p2272_p13  ;;  %s1560_s29 = scalar_lea.vmem %s1559_s9, 512 }
 0x1a4   : > { %v978_v51 = vld [vmem:[#allocation2 + $0x8] sm:$0xff]  ;;  %979 = vst [vmem:[%s1864_s15] sm:$0xff] %v977_v50  ;;  %p1561_p8 = scmp.lt.s32.totalorder %s999_s12, %s1559_s9  ;;  %p1562_p2 = scmp.lt.s32.totalorder %s1560_s29, %s1554_s11 }
 0x1a5   : > { %980 = vst [vmem:[%s1864_s15 + $0x8] sm:$0xff] %v978_v51  ;;  %p1557_p5 = pneg %p1556_p3 }
 0x1a6   : > { %p1563_p0 = por %p1562_p2, %p1561_p8 }
 0x1a8   : > { %p1564_p7 = pnand %p1563_p0, %p1557_p5 }
 0x1aa   : > { %1567 = shalt.err (!%p1564_p7)
}
 0x1ab   : > { %s1568_s7 = scalar_lea.hbm %s2201_s8, 256  ;;  %s1572_s16 = scalar_lea.hbm %s2258_s4, 512 }
 0x1ac   : > { %p1569_p10 = scmp.ne.s32.totalorder %s2201_s8, %s1568_s7  ;;  %p1573_p4 = scmp.lt.u32.totalorder %s2201_s8, %s2258_s4 }
 0x1ad   : > { %p1574_p6 = scmp.lt.u32.totalorder %s1572_s16, %s1568_s7  ;;  %p1576_p11 = scmp.lt.u32.totalorder %s1568_s7, %s2201_s8 }
 0x1ae   : > { %p1570_p12 = pnand %p1569_p10, %p2272_p13 }
 0x1af   : > { %p1575_p9 = por %p1574_p6, %p1573_p4 }
 0x1b0   : > { %p1571_p1 = pneg %p1570_p12 }
 0x1b1   : > { %p1577_p3 = por %p1576_p11, %p1575_p9 }
 0x1b3   : > { %p1578_p5 = pnand %p1577_p3, %p1571_p1 }
 0x1b5   : > { %1581 = shalt.err (!%p1578_p5)
}
 0x1b6   : > { %1398 = dma.vmem_to_hbm [thread:$0]  (%p2272_p13), %s999_s12, 256, %s2201_s8, %s982_s0  }
 0x1b7 PF: > { %s1010_s20 = sand.u32 1, %s1630_s1   ;;  %p2273_p8 = scmp.ne.s32.totalorder %s2267_s22, 0 }
 0x1b8   : > { %p2274_p2 = scmp.ge.s32.totalorder %s1662_s5, 2  ;;  %s1011_s21 = scalar_lea.sflag [#allocation8], %s1010_s20 }
 0x1ba   : > { %p1407_p0 = pnand %p2274_p2, %p2273_p8 }
 0x1bc   : > { %1625 = dma.done.wait (!%p1407_p0), %s1011_s21, 256  }
 0x1bd   : > { %1627 = vsyncadd (!%p1407_p0), %s1011_s21, 4294967040  ;;  %s30_s5 = sadd.s32 1, %s1662_s5   ;;  %s2275_s19 = sld [smem:[#allocation16_spill]] }
 0x1be   : > { %p27_p7 = scmp.ge.s32.totalorder %s30_s5, 4   ;;  %s2276_s6 = sld [smem:[#allocation15_spill]] }
 0x1bf   : > { %s2277_s1 = smov %s1634_s24  ;;  %s2278_s24 = smov %s1638_s25 }
 0x1c0   : > { %s2279_s25 = smov %s1774_s18  ;;  %s2280_s26 = smov %s1646_s27 }
 0x1c1   : > { %s2281_s27 = smov %s1650_s28  ;;  %s2283_s29 = smov %s1658_s30 }
 0x1c2   :  { %29 = sbr.rel (!%p27_p7) target bundleno = 33 (0x21), region = 88 }
 0x1c3   : > { %s2282_s28 = smov %s2275_s19 }
 0x1c4   : > { %s2284_s30 = smov %s2276_s6 }
 0x1c9   :  { %1016 = vsyncpa [#allocation7], 1 }
 0x1ca   :  { %1018 = vsyncpa [#allocation7 + $0x1], 1 }
 0x1cb   :  { %1019 = vsyncpa [#allocation8], 1 }
 0x1cc   :  { %1021 = vsyncpa [#allocation8 + $0x1], 1 }

</bundles_post_ra>
